<compile_context>
chip_gen: v7x
topology: tpu7x:2x2x1
jax: 0.10.0
libtpu: 0.0.40
codegen_flags: <defaults>
</compile_context>

<pallas_src>
import jax
import jax.numpy as jnp
from jax.experimental import pallas as pl
from jax.experimental.pallas import tpu as pltpu

SEQ = 2
HIDDEN = 12
INPUT = 1
GP = 16          # per-gate sublane padding (HIDDEN=12 -> 16, multiple of 8)
G4 = 4 * GP      # all 4 gates (i, f, g, o) packed along sublanes


def _round_up(n, m):
    return ((n + m - 1) // m) * m


def lstm_linear_kernel(x_ref, w_ih_ref, w_hh_ref, b_ref, amul_ref, aadd_ref,
                       w_lin_ref, b_lin_ref, out_ref):
    """One batch tile of: single-layer LSTM (gate order i,f,g,o) + Linear head.

    Layout: hidden/gate channels on SUBLANES, batch on LANES.

    Refs (per grid step):
      x_ref     : (SEQ, 1, TB) f32 VMEM   inputs, batch on lanes
      w_ih_ref  : (G4, 1)      f32 VMEM   packed input weights (pre-scaled)
      w_hh_ref  : (G4, GP)     f32 VMEM   packed recurrent weights (pre-scaled)
      b_ref     : (G4, 1)      f32 VMEM   fused bias b_ih+b_hh (pre-scaled)
      amul_ref  : (G4, 1)      f32 VMEM   activation affine: multiplier
      aadd_ref  : (G4, 1)      f32 VMEM   activation affine: offset
      w_lin_ref : (SEQ, GP, 1) f32 VMEM   per-timestep head weights
      b_lin_ref : (1,)         f32 SMEM   head bias (scalar)
      out_ref   : (1, 1, TB)   f32 VMEM   lane-dense output row
    """
    w_ih = w_ih_ref[...]        # (G4, 1)
    w_hh = w_hh_ref[...]        # (G4, GP)
    b = b_ref[...]              # (G4, 1)
    amul = amul_ref[...]        # (G4, 1)
    aadd = aadd_ref[...]        # (G4, 1)

    h = None
    c = None
    acc = None

    # SEQ is a small static constant -> fully unrolled at trace time.
    for t in range(SEQ):
        x_row = x_ref[t]                         # (1, TB)

        # Input projection (INPUT == 1): pure VPU outer-product broadcast,
        # off the serial recurrence chain.
        z = w_ih * x_row + b                     # (G4, TB)
        if h is not None:
            # Recurrent term: ONE tiny MXU matmul over the packed gate block.
            z = z + jnp.dot(w_hh, h, preferred_element_type=jnp.float32)

        # Single EUP sweep over the packed block.  For the sigmoid rows
        # (i, f, o) z was pre-scaled by 0.5 in the wrapper, so
        #   sigmoid(g) = 0.5 * tanh(g/2) + 0.5 = amul * tanh(z) + aadd,
        # and the g rows use amul=1, aadd=0 (plain tanh).  Padded rows use
        # amul=aadd=0 so they stay exactly zero.
        act = jnp.tanh(z) * amul + aadd          # (G4, TB)

        # Gate extraction: 8-aligned sublane slices -> zero-cost views.
        i_g = act[0 * GP:1 * GP]                 # (GP, TB)
        f_g = act[1 * GP:2 * GP]
        g_g = act[2 * GP:3 * GP]
        o_g = act[3 * GP:4 * GP]

        c = i_g * g_g if c is None else f_g * c + i_g * g_g
        h = o_g * jnp.tanh(c)                    # (GP, TB)

        # Head: per-timestep elementwise accumulation (replaces the concat
        # + (B, 24) @ (24, 1) matmul of the reference).
        head = h * w_lin_ref[t]                  # (GP, TB) * (GP, 1)
        acc = head if acc is None else acc + head

    # Lane-dense output row: cheap sublane reduction over 16 rows -> (1, TB).
    out = jnp.sum(acc, axis=0, keepdims=True) + b_lin_ref[0]
    out_ref[...] = out[None].astype(out_ref.dtype)      # (1, 1, TB)


def net_forward(x, w_ih, w_hh, b_ih, b_hh, w_lin, b_lin, *, block_b=1024):
    """JAX-side glue: gate packing along sublanes, batch-on-lanes tiling."""
    x = jnp.asarray(x, jnp.float32)
    B = x.shape[0]

    # (B, SEQ, 1) -> (SEQ, B): batch moves to the LANE axis.
    x2 = x.reshape(B, SEQ).T                               # (SEQ, B)

    # Batch tile: multiple of 128 lanes, capped at block_b, and >= 2 grid
    # steps whenever B > 128 so the "parallel" axis can use both v7x TCs.
    if B <= 128:
        TB = 128
    else:
        TB = min(block_b, _round_up(B, 256) // 2)
    B_pad = _round_up(B, TB)
    if B_pad != B:
        x2 = jnp.pad(x2, ((0, 0), (0, B_pad - B)))
    x3 = x2.reshape(SEQ, 1, B_pad)

    w_ih = jnp.asarray(w_ih, jnp.float32)                  # (4H, INPUT)
    w_hh = jnp.asarray(w_hh, jnp.float32)                  # (4H, H)
    bias = jnp.asarray(b_ih, jnp.float32) + jnp.asarray(b_hh, jnp.float32)
    w_lin_rows = jnp.asarray(w_lin, jnp.float32).reshape(SEQ, HIDDEN)

    # Pack gates along sublanes: gate k -> rows [k*GP, k*GP + HIDDEN).
    # Sigmoid gates (i, f, o) are pre-scaled by 0.5 so the in-kernel
    # single-tanh + affine reproduces sigmoid exactly.
    w_ih_col = jnp.zeros((G4, 1), jnp.float32)
    w_hh_mat = jnp.zeros((G4, GP), jnp.float32)
    b_col = jnp.zeros((G4, 1), jnp.float32)
    amul = jnp.zeros((G4, 1), jnp.float32)
    aadd = jnp.zeros((G4, 1), jnp.float32)
    for k in range(4):                                     # gate order i,f,g,o
        s = 1.0 if k == 2 else 0.5
        rows = slice(k * GP, k * GP + HIDDEN)
        w_ih_col = w_ih_col.at[rows, 0].set(s * w_ih[k * HIDDEN:(k + 1) * HIDDEN, 0])
        w_hh_mat = w_hh_mat.at[rows, :HIDDEN].set(s * w_hh[k * HIDDEN:(k + 1) * HIDDEN, :])
        b_col = b_col.at[rows, 0].set(s * bias[k * HIDDEN:(k + 1) * HIDDEN])
        amul = amul.at[rows, 0].set(1.0 if k == 2 else 0.5)
        aadd = aadd.at[rows, 0].set(0.0 if k == 2 else 0.5)

    # Head weights per timestep, padded to GP rows.
    w_lin_pad = jnp.zeros((SEQ, GP, 1), jnp.float32).at[:, :HIDDEN, 0].set(w_lin_rows)

    b_lin1 = jnp.asarray(b_lin, jnp.float32).reshape(1)    # scalar -> SMEM

    n_tiles = B_pad // TB
    out = pl.pallas_call(
        lstm_linear_kernel,
        out_shape=jax.ShapeDtypeStruct((n_tiles, 1, TB), jnp.float32),
        grid_spec=pltpu.PrefetchScalarGridSpec(
            num_scalar_prefetch=0,
            grid=(n_tiles,),
            in_specs=[
                pl.BlockSpec((SEQ, 1, TB), lambda i: (0, 0, i)),      # x tile
                pl.BlockSpec((G4, 1), lambda i: (0, 0)),              # w_ih (resident)
                pl.BlockSpec((G4, GP), lambda i: (0, 0)),             # w_hh (resident)
                pl.BlockSpec((G4, 1), lambda i: (0, 0)),              # bias (resident)
                pl.BlockSpec((G4, 1), lambda i: (0, 0)),              # act mul
                pl.BlockSpec((G4, 1), lambda i: (0, 0)),              # act add
                pl.BlockSpec((SEQ, GP, 1), lambda i: (0, 0, 0)),      # w_lin (resident)
                pl.BlockSpec(memory_space=pltpu.MemorySpace.SMEM),    # b_lin scalar
            ],
            out_specs=pl.BlockSpec((1, 1, TB), lambda i: (i, 0, 0)),  # lane-dense row
        ),
        compiler_params=pltpu.CompilerParams(
            dimension_semantics=("parallel",)),
    )(x3, w_ih_col, w_hh_mat, b_col, amul, aadd, w_lin_pad, b_lin1)

    return out.reshape(B_pad)[:B].reshape(B, 1)


def net_forward_ref(x, w_ih, w_hh, b_ih, b_hh, w_lin, b_lin):
    """Pure-JAX reference (mirrors PyTorch LSTM + Linear) for validation."""
    B = x.shape[0]
    H = HIDDEN
    h = jnp.zeros((B, H), jnp.float32)
    c = jnp.zeros((B, H), jnp.float32)
    hs = []
    for t in range(SEQ):
        gates = x[:, t, :] @ w_ih.T + h @ w_hh.T + b_ih + b_hh
        i_g = jax.nn.sigmoid(gates[:, 0 * H:1 * H])
        f_g = jax.nn.sigmoid(gates[:, 1 * H:2 * H])
        g_g = jnp.tanh(gates[:, 2 * H:3 * H])
        o_g = jax.nn.sigmoid(gates[:, 3 * H:4 * H])
        c = f_g * c + i_g * g_g
        h = o_g * jnp.tanh(c)
        hs.append(h)
    feat = jnp.stack(hs, axis=1).reshape(B, SEQ * H)
    return feat @ w_lin.T + b_lin


if __name__ == "__main__":
    key = jax.random.PRNGKey(0)
    ks = jax.random.split(key, 7)

    B = 4
    # PyTorch default init: U(-1/sqrt(hidden), 1/sqrt(hidden)) for LSTM,
    # U(-1/sqrt(fan_in), 1/sqrt(fan_in)) for Linear.
    k_lstm = 1.0 / (HIDDEN ** 0.5)
    k_lin = 1.0 / ((HIDDEN * SEQ) ** 0.5)

    w_ih = jax.random.uniform(ks[0], (4 * HIDDEN, INPUT),
                              minval=-k_lstm, maxval=k_lstm, dtype=jnp.float32)
    w_hh = jax.random.uniform(ks[1], (4 * HIDDEN, HIDDEN),
                              minval=-k_lstm, maxval=k_lstm, dtype=jnp.float32)
    b_ih = jax.random.uniform(ks[2], (4 * HIDDEN,),
                              minval=-k_lstm, maxval=k_lstm, dtype=jnp.float32)
    b_hh = jax.random.uniform(ks[3], (4 * HIDDEN,),
                              minval=-k_lstm, maxval=k_lstm, dtype=jnp.float32)
    w_lin = jax.random.uniform(ks[4], (1, HIDDEN * SEQ),
                               minval=-k_lin, maxval=k_lin, dtype=jnp.float32)
    b_lin = jax.random.uniform(ks[5], (1,),
                               minval=-k_lin, maxval=k_lin, dtype=jnp.float32)

    x = jax.random.normal(ks[6], (B, SEQ, INPUT), dtype=jnp.float32)

    out = net_forward(x, w_ih, w_hh, b_ih, b_hh, w_lin, b_lin)
    out = jax.block_until_ready(out)
    ref = net_forward_ref(x, w_ih, w_hh, b_ih, b_hh, w_lin, b_lin)
    assert out.shape == (B, 1), out.shape
    assert jnp.allclose(out, ref, atol=1e-4, rtol=1e-4), (out, ref)

    # Multi-tile path: B > 128 -> >= 2 grid steps on the "parallel" batch axis.
    B2 = 300
    x_big = jax.random.normal(jax.random.PRNGKey(1), (B2, SEQ, INPUT),
                              dtype=jnp.float32)
    out_big = jax.block_until_ready(
        net_forward(x_big, w_ih, w_hh, b_ih, b_hh, w_lin, b_lin))
    ref_big = net_forward_ref(x_big, w_ih, w_hh, b_ih, b_hh, w_lin, b_lin)
    assert out_big.shape == (B2, 1), out_big.shape
    assert jnp.allclose(out_big, ref_big, atol=1e-4, rtol=1e-4)

    print("KERNEL_OK")
</pallas_src>

<mosaic_0001>
module attributes {stable_mosaic.version = 11 : i64} {
  func.func @lstm_linear_kernel(%arg0: i32, %arg1: memref<2x1x128xf32, #tpu.memory_space<vmem>>, %arg2: memref<64x1xf32, #tpu.memory_space<vmem>>, %arg3: memref<64x16xf32, #tpu.memory_space<vmem>>, %arg4: memref<64x1xf32, #tpu.memory_space<vmem>>, %arg5: memref<64x1xf32, #tpu.memory_space<vmem>>, %arg6: memref<64x1xf32, #tpu.memory_space<vmem>>, %arg7: memref<2x16x1xf32, #tpu.memory_space<vmem>>, %arg8: memref<1xf32, #tpu.memory_space<smem>>, %arg9: memref<1x1x128xf32, #tpu.memory_space<vmem>>) attributes {dimension_semantics = [#tpu.dimension_semantics<parallel>], iteration_bounds = array<i64: 1>, scalar_prefetch = 0 : i64, scratch_operands = 0 : i64, tpu.core_type = #tpu.core_type<tc>, window_params = [{transform_indices = @transform_0, window_bounds = array<i64: 2, 1, 128>}, {pipeline_mode = #tpu.pipeline_mode<synchronous>, transform_indices = @transform_1, window_bounds = array<i64: 64, 1>}, {pipeline_mode = #tpu.pipeline_mode<synchronous>, transform_indices = @transform_2, window_bounds = array<i64: 64, 16>}, {pipeline_mode = #tpu.pipeline_mode<synchronous>, transform_indices = @transform_3, window_bounds = array<i64: 64, 1>}, {pipeline_mode = #tpu.pipeline_mode<synchronous>, transform_indices = @transform_4, window_bounds = array<i64: 64, 1>}, {pipeline_mode = #tpu.pipeline_mode<synchronous>, transform_indices = @transform_5, window_bounds = array<i64: 64, 1>}, {pipeline_mode = #tpu.pipeline_mode<synchronous>, transform_indices = @transform_6, window_bounds = array<i64: 2, 16, 1>}, {transform_indices = @transform_7, window_bounds = array<i64: 1>}, {transform_indices = @transform_8, window_bounds = array<i64: 1, 1, 128>}]} {
    %c0 = arith.constant 0 : index
    %c0_0 = arith.constant 0 : index
    %0 = vector.load %arg2[%c0, %c0_0] : memref<64x1xf32, #tpu.memory_space<vmem>>, vector<64x1xf32>
    %c0_1 = arith.constant 0 : index
    %c0_2 = arith.constant 0 : index
    %1 = vector.load %arg3[%c0_1, %c0_2] : memref<64x16xf32, #tpu.memory_space<vmem>>, vector<64x16xf32>
    %c0_3 = arith.constant 0 : index
    %c0_4 = arith.constant 0 : index
    %2 = vector.load %arg4[%c0_3, %c0_4] : memref<64x1xf32, #tpu.memory_space<vmem>>, vector<64x1xf32>
    %c0_5 = arith.constant 0 : index
    %c0_6 = arith.constant 0 : index
    %3 = vector.load %arg5[%c0_5, %c0_6] : memref<64x1xf32, #tpu.memory_space<vmem>>, vector<64x1xf32>
    %c0_7 = arith.constant 0 : index
    %c0_8 = arith.constant 0 : index
    %4 = vector.load %arg6[%c0_7, %c0_8] : memref<64x1xf32, #tpu.memory_space<vmem>>, vector<64x1xf32>
    %c0_9 = arith.constant 0 : index
    %c0_10 = arith.constant 0 : index
    %c0_11 = arith.constant 0 : index
    %5 = vector.load %arg1[%c0_9, %c0_10, %c0_11] : memref<2x1x128xf32, #tpu.memory_space<vmem>>, vector<1x1x128xf32>
    %6 = vector.shape_cast %5 : vector<1x1x128xf32> to vector<1x128xf32>
    %7 = vector.broadcast %0 : vector<64x1xf32> to vector<64x128xf32>
    %8 = vector.broadcast %6 : vector<1x128xf32> to vector<64x128xf32>
    %9 = arith.mulf %7, %8 : vector<64x128xf32>
    %10 = vector.broadcast %2 : vector<64x1xf32> to vector<64x128xf32>
    %11 = arith.addf %9, %10 : vector<64x128xf32>
    %12 = math.tanh %11 : vector<64x128xf32>
    %13 = vector.broadcast %3 : vector<64x1xf32> to vector<64x128xf32>
    %14 = arith.mulf %12, %13 : vector<64x128xf32>
    %15 = vector.broadcast %4 : vector<64x1xf32> to vector<64x128xf32>
    %16 = arith.addf %14, %15 : vector<64x128xf32>
    %17 = vector.extract_strided_slice %16 {offsets = [0, 0], sizes = [16, 128], strides = [1, 1]} : vector<64x128xf32> to vector<16x128xf32>
    %18 = vector.extract_strided_slice %16 {offsets = [32, 0], sizes = [16, 128], strides = [1, 1]} : vector<64x128xf32> to vector<16x128xf32>
    %19 = vector.extract_strided_slice %16 {offsets = [48, 0], sizes = [16, 128], strides = [1, 1]} : vector<64x128xf32> to vector<16x128xf32>
    %20 = arith.mulf %17, %18 : vector<16x128xf32>
    %21 = math.tanh %20 : vector<16x128xf32>
    %22 = arith.mulf %19, %21 : vector<16x128xf32>
    %c0_12 = arith.constant 0 : index
    %c0_13 = arith.constant 0 : index
    %c0_14 = arith.constant 0 : index
    %23 = vector.load %arg7[%c0_12, %c0_13, %c0_14] : memref<2x16x1xf32, #tpu.memory_space<vmem>>, vector<1x16x1xf32>
    %24 = vector.shape_cast %23 : vector<1x16x1xf32> to vector<16x1xf32>
    %25 = vector.broadcast %24 : vector<16x1xf32> to vector<16x128xf32>
    %26 = arith.mulf %22, %25 : vector<16x128xf32>
    %c1 = arith.constant 1 : index
    %c0_15 = arith.constant 0 : index
    %c0_16 = arith.constant 0 : index
    %27 = vector.load %arg1[%c1, %c0_15, %c0_16] : memref<2x1x128xf32, #tpu.memory_space<vmem>>, vector<1x1x128xf32>
    %28 = vector.shape_cast %27 : vector<1x1x128xf32> to vector<1x128xf32>
    %29 = vector.broadcast %0 : vector<64x1xf32> to vector<64x128xf32>
    %30 = vector.broadcast %28 : vector<1x128xf32> to vector<64x128xf32>
    %31 = arith.mulf %29, %30 : vector<64x128xf32>
    %32 = vector.broadcast %2 : vector<64x1xf32> to vector<64x128xf32>
    %33 = arith.addf %31, %32 : vector<64x128xf32>
    %cst = arith.constant dense<0.000000e+00> : vector<64x128xf32>
    %34 = tpu.matmul %1, %22, %cst {dimension_numbers = #tpu.dot_dimension_numbers<[1], [0], [0], [1], [0, 0, 1, 1], [], []>} : vector<64x16xf32>, vector<16x128xf32>, vector<64x128xf32> -> vector<64x128xf32>
    %35 = arith.addf %33, %34 : vector<64x128xf32>
    %36 = math.tanh %35 : vector<64x128xf32>
    %37 = vector.broadcast %3 : vector<64x1xf32> to vector<64x128xf32>
    %38 = arith.mulf %36, %37 : vector<64x128xf32>
    %39 = vector.broadcast %4 : vector<64x1xf32> to vector<64x128xf32>
    %40 = arith.addf %38, %39 : vector<64x128xf32>
    %41 = vector.extract_strided_slice %40 {offsets = [0, 0], sizes = [16, 128], strides = [1, 1]} : vector<64x128xf32> to vector<16x128xf32>
    %42 = vector.extract_strided_slice %40 {offsets = [16, 0], sizes = [16, 128], strides = [1, 1]} : vector<64x128xf32> to vector<16x128xf32>
    %43 = vector.extract_strided_slice %40 {offsets = [32, 0], sizes = [16, 128], strides = [1, 1]} : vector<64x128xf32> to vector<16x128xf32>
    %44 = vector.extract_strided_slice %40 {offsets = [48, 0], sizes = [16, 128], strides = [1, 1]} : vector<64x128xf32> to vector<16x128xf32>
    %45 = arith.mulf %42, %20 : vector<16x128xf32>
    %46 = arith.mulf %41, %43 : vector<16x128xf32>
    %47 = arith.addf %45, %46 : vector<16x128xf32>
    %48 = math.tanh %47 : vector<16x128xf32>
    %49 = arith.mulf %44, %48 : vector<16x128xf32>
    %c1_17 = arith.constant 1 : index
    %c0_18 = arith.constant 0 : index
    %c0_19 = arith.constant 0 : index
    %50 = vector.load %arg7[%c1_17, %c0_18, %c0_19] : memref<2x16x1xf32, #tpu.memory_space<vmem>>, vector<1x16x1xf32>
    %51 = vector.shape_cast %50 : vector<1x16x1xf32> to vector<16x1xf32>
    %52 = vector.broadcast %51 : vector<16x1xf32> to vector<16x128xf32>
    %53 = arith.mulf %49, %52 : vector<16x128xf32>
    %54 = arith.addf %26, %53 : vector<16x128xf32>
    %cst_20 = arith.constant dense<0.000000e+00> : vector<128xf32>
    %55 = vector.multi_reduction <add>, %54, %cst_20 [0] : vector<16x128xf32> to vector<128xf32>
    %56 = vector.shape_cast %55 : vector<128xf32> to vector<1x128xf32>
    %c0_21 = arith.constant 0 : index
    %57 = memref.load %arg8[%c0_21] : memref<1xf32, #tpu.memory_space<smem>>
    %58 = vector.broadcast %57 : f32 to vector<1x128xf32>
    %59 = arith.addf %56, %58 : vector<1x128xf32>
    %60 = vector.shape_cast %59 : vector<1x128xf32> to vector<1x1x128xf32>
    %c0_22 = arith.constant 0 : index
    %c0_23 = arith.constant 0 : index
    %c0_24 = arith.constant 0 : index
    %61 = vector.load %arg9[%c0_22, %c0_23, %c0_24] : memref<1x1x128xf32, #tpu.memory_space<vmem>>, vector<1x1x128xf32>
    tpu.vector_store %arg9[%c0_22, %c0_23, %c0_24], %60 {strides = array<i32>} : memref<1x1x128xf32, #tpu.memory_space<vmem>>, vector<1x1x128xf32>,
    return
  }
  func.func @transform_0(%arg0: i32) -> (i32, i32, i32) {
    %c0_i32 = arith.constant 0 : i32
    %c0_i32_0 = arith.constant 0 : i32
    %c0_i32_1 = arith.constant 0 : i32
    return %c0_i32, %c0_i32_0, %arg0 : i32, i32, i32
  }
  func.func @transform_1(%arg0: i32) -> (i32, i32) {
    %c0_i32 = arith.constant 0 : i32
    %c0_i32_0 = arith.constant 0 : i32
    %c0_i32_1 = arith.constant 0 : i32
    return %c0_i32, %c0_i32_0 : i32, i32
  }
  func.func @transform_2(%arg0: i32) -> (i32, i32) {
    %c0_i32 = arith.constant 0 : i32
    %c0_i32_0 = arith.constant 0 : i32
    %c0_i32_1 = arith.constant 0 : i32
    return %c0_i32, %c0_i32_0 : i32, i32
  }
  func.func @transform_3(%arg0: i32) -> (i32, i32) {
    %c0_i32 = arith.constant 0 : i32
    %c0_i32_0 = arith.constant 0 : i32
    %c0_i32_1 = arith.constant 0 : i32
    return %c0_i32, %c0_i32_0 : i32, i32
  }
  func.func @transform_4(%arg0: i32) -> (i32, i32) {
    %c0_i32 = arith.constant 0 : i32
    %c0_i32_0 = arith.constant 0 : i32
    %c0_i32_1 = arith.constant 0 : i32
    return %c0_i32, %c0_i32_0 : i32, i32
  }
  func.func @transform_5(%arg0: i32) -> (i32, i32) {
    %c0_i32 = arith.constant 0 : i32
    %c0_i32_0 = arith.constant 0 : i32
    %c0_i32_1 = arith.constant 0 : i32
    return %c0_i32, %c0_i32_0 : i32, i32
  }
  func.func @transform_6(%arg0: i32) -> (i32, i32, i32) {
    %c0_i32 = arith.constant 0 : i32
    %c0_i32_0 = arith.constant 0 : i32
    %c0_i32_1 = arith.constant 0 : i32
    %c0_i32_2 = arith.constant 0 : i32
    return %c0_i32, %c0_i32_0, %c0_i32_1 : i32, i32, i32
  }
  func.func @transform_7(%arg0: i32) -> i32 {
    %c0_i32 = arith.constant 0 : i32
    %c0_i32_0 = arith.constant 0 : i32
    return %c0_i32 : i32
  }
  func.func @transform_8(%arg0: i32) -> (i32, i32, i32) {
    %c0_i32 = arith.constant 0 : i32
    %c0_i32_0 = arith.constant 0 : i32
    %c0_i32_1 = arith.constant 0 : i32
    return %arg0, %c0_i32, %c0_i32_0 : i32, i32, i32
  }
}

</mosaic_0001>

<bundles_post_ra>
// kernel: tpu_custom_call.1
= control target key start
LH: loop header
LB: loop body
LE: loop exit
PB: predicated region body
PF: predicated region fallthrough
CT: control target
= control target key end

     0   :  { %v635_v2 = vmov 0   ;;  %s935_s0 = inlined_call_operand.vmem [shape: f32[2,1,128], index: 0, kind: input, shape index: {}]   ;;  %s936_s1 = inlined_call_operand.vmem [shape: f32[64,1], index: 1, kind: input, shape index: {}]   ;;  %s937_s2 = inlined_call_operand.vmem [shape: f32[64,16], index: 2, kind: input, shape index: {}]   ;;  %s938_s3 = inlined_call_operand.vmem [shape: f32[64,1], index: 3, kind: input, shape index: {}]   ;;  %s939_s4 = inlined_call_operand.vmem [shape: f32[64,1], index: 4, kind: input, shape index: {}]   ;;  %s940_s5 = inlined_call_operand.vmem [shape: f32[64,1], index: 5, kind: input, shape index: {}]   ;;  %s941_s6 = inlined_call_operand.vmem [shape: f32[2,16,1], index: 6, kind: input, shape index: {}]   ;;  %s942_s7 = inlined_call_operand.<no memory space> [shape: f32[1], index: 7, kind: input, shape index: {}]   ;;  %s943_s8 = inlined_call_operand.hbm [shape: f32[1,1,128], index: 8, kind: output, shape index: {}]  }
   0x1   :  { %v35_v0 = vld [vmem:[%s936_s1 + $0x20] sm:$0xff]  ;;  %574 = vset.pattern.permute.xlu1 %v635_v2  ;;  %573 = vset.pattern.permute.xlu0 %v635_v2  ;;  %v36_v3 = vld [vmem:[%s936_s1 + $0x28] sm:$0xff] }
   0x2   :  { %v31_v1 = vld [vmem:[%s936_s1] sm:$0xff]  ;;  %94 = vperm.xlu1 %574, %v35_v0   ;;  %v32_v4 = vld [vmem:[%s936_s1 + $0x8] sm:$0xff] }
   0x3   :  { %74 = vperm.xlu0 %573, %v31_v1   ;;  %v48_v5 = vld [vmem:[%s938_s3 + $0x8] sm:$0xff]  ;;  %v47_v6 = vld [vmem:[%s938_s3] sm:$0xff] }
   0x4   :  { %v52_v7 = vld [vmem:[%s938_s3 + $0x28] sm:$0xff]  ;;  %v51_v8 = vld [vmem:[%s938_s3 + $0x20] sm:$0xff] }
   0x6   :  { %99 = vperm.xlu1 %574, %v36_v3  }
   0x7   :  { %79 = vperm.xlu0 %573, %v32_v4  }
   0xa   :  { %131 = vperm.xlu1 %574, %v48_v5  }
   0xb   :  { %126 = vperm.xlu0 %573, %v47_v6  }
   0xc   :  { %14 = vsyncpa [#allocation4], 0  ;;  %v38_v9 = vld [vmem:[%s936_s1 + $0x38] sm:$0xff]  ;;  %v37_v10 = vld [vmem:[%s936_s1 + $0x30] sm:$0xff]  ;;  %vm312_vm0 = vcmask 130048   ;;  %s636_s24 = smov [#allocation3]  }
   0xd   :  { %v54_v11 = vld [vmem:[%s938_s3 + $0x38] sm:$0xff]  ;;  %v53_v12 = vld [vmem:[%s938_s3 + $0x30] sm:$0xff]  ;;  %v56_v13 = vld [vmem:[%s939_s4 + $0x8] sm:$0xff]  ;;  %s518_s25 = sshll.u32 %s636_s24, 4  ;;  %s519_s25 = int_to_ptr.vmem [resolvable:$true] %s518_s25 }
   0xe   :  { %151 = vperm.xlu1 %574, %v52_v7   ;;  %v55_v14 = vld [vmem:[%s939_s4] sm:$0xff]  ;;  %v60_v15 = vld [vmem:[%s939_s4 + $0x28] sm:$0xff]  ;;  %v62_v21 = vld [vmem:[%s939_s4 + $0x38] sm:$0xff]  ;;  %s611_s26 = scalar_lea.vmem %s519_s25, 16  ;;  %p616_p1 = scmp.lt.s32.totalorder %s519_s25, %s519_s25 }
   0xf   :  { %146 = vperm.xlu0 %573, %v51_v8   ;;  %v59_v16 = vld [vmem:[%s939_s4 + $0x20] sm:$0xff]  ;;  %v64_v17 = vld [vmem:[%s940_s5 + $0x8] sm:$0xff]  ;;  %v61_v22 = vld [vmem:[%s939_s4 + $0x30] sm:$0xff]  ;;  %p612_p0 = scmp.ne.s32.totalorder %s519_s25, %s611_s26 }
  0x10   :  { %v63_v18 = vld [vmem:[%s940_s5] sm:$0xff]  ;;  %v68_v19 = vld [vmem:[%s940_s5 + $0x28] sm:$0xff]  ;;  %v70_v23 = vld [vmem:[%s940_s5 + $0x38] sm:$0xff] }
  0x11   :  { %v67_v20 = vld [vmem:[%s940_s5 + $0x20] sm:$0xff]  ;;  %v69_v24 = vld [vmem:[%s940_s5 + $0x30] sm:$0xff]  ;;  %v34_v25 = vld [vmem:[%s936_s1 + $0x18] sm:$0xff] }
  0x12   :  { %109 = vperm.xlu1 %574, %v38_v9   ;;  %v33_v26 = vld [vmem:[%s936_s1 + $0x10] sm:$0xff]  ;;  %v50_v27 = vld [vmem:[%s938_s3 + $0x18] sm:$0xff]  ;;  %v39_v33 = vld [vmem:[%s937_s2] sm:$0xff] }
  0x13   :  { %104 = vperm.xlu0 %573, %v37_v10   ;;  %v49_v28 = vld [vmem:[%s938_s3 + $0x10] sm:$0xff]  ;;  %v58_v29 = vld [vmem:[%s939_s4 + $0x18] sm:$0xff]  ;;  %v43_v34 = vld [vmem:[%s937_s2 + $0x20] sm:$0xff]  ;;  %553 = vmatprep.mubr.msk.f32.mxu0 %vm312_vm0, %v39_v33 }
  0x14   :  { %v57_v30 = vld [vmem:[%s939_s4 + $0x10] sm:$0xff]  ;;  %v66_v31 = vld [vmem:[%s940_s5 + $0x18] sm:$0xff]  ;;  %559 = vmatprep.mubr.msk.f32.mxu1 %vm312_vm0, %v43_v34  ;;  %v275_v35 = vld [vmem:[%s941_s6 + $0x8] sm:$0xff]  ;;  %s615_s4 = scalar_lea.vmem %s519_s25, 32 }
  0x15   :  { %v65_v32 = vld [vmem:[%s940_s5 + $0x10] sm:$0xff]  ;;  %v274_v36 = vld [vmem:[%s941_s6] sm:$0xff]  ;;  %v538_v37 = vld [vmem:[%s941_s6 + $0x18] sm:$0xff]  ;;  %p617_p2 = scmp.lt.s32.totalorder %s615_s4, %s611_s26 }
  0x16   :  { %161 = vperm.xlu1 %574, %v54_v11   ;;  %v537_v38 = vld [vmem:[%s941_s6 + $0x10] sm:$0xff]  ;;  %v801_v41 = vld [vmem:[%s935_s0 + $0x1] ss:$0 sm:$0xff]  ;;  %v526_v54 = vld [vmem:[%s935_s0] ss:$0 sm:$0xff] }
  0x17   :  { %156 = vperm.xlu0 %573, %v53_v12   ;;  %p618_p3 = por %p617_p2, %p616_p1 }
  0x19   :  { %p619_p4 = pnand %p618_p3, %p612_p0 }
  0x1a   :  { %183 = vperm.xlu1 %574, %v56_v13  }
  0x1b   :  { %178 = vperm.xlu0 %573, %v55_v14  }
  0x1e   :  { %203 = vperm.xlu1 %574, %v60_v15  }
  0x1f   :  { %198 = vperm.xlu0 %573, %v59_v16  }
  0x22   :  { %229 = vperm.xlu1 %574, %v64_v17  }
  0x23   :  { %224 = vperm.xlu0 %573, %v63_v18  }
  0x26   :  { %249 = vperm.xlu1 %574, %v68_v19  }
  0x27   :  { %244 = vperm.xlu0 %573, %v67_v20  }
  0x2a   :  { %213 = vperm.xlu1 %574, %v62_v21  }
  0x2b   :  { %208 = vperm.xlu0 %573, %v61_v22  }
  0x2e   :  { %259 = vperm.xlu1 %574, %v70_v23  }
  0x2f   :  { %254 = vperm.xlu0 %573, %v69_v24  }
  0x32   :  { %89 = vperm.xlu1 %574, %v34_v25  }
  0x33   :  { %84 = vperm.xlu0 %573, %v33_v26  }
  0x36   :  { %141 = vperm.xlu1 %574, %v50_v27  }
  0x37   :  { %136 = vperm.xlu0 %573, %v49_v28  }
  0x3a   :  { %193 = vperm.xlu1 %574, %v58_v29  }
  0x3b   :  { %188 = vperm.xlu0 %573, %v57_v30  }
  0x3e   :  { %239 = vperm.xlu1 %574, %v66_v31  }
  0x3f   :  { %234 = vperm.xlu0 %573, %v65_v32  }
  0x42   :  { %283 = vperm.xlu1 %574, %v275_v35  }
  0x43   :  { %278 = vperm.xlu0 %573, %v274_v36  }
  0x46   :  { %494 = vperm.xlu1 %574, %v538_v37  }
  0x47   :  { %489 = vperm.xlu0 %573, %v537_v38  }
  0x81   :  { %v95_v39 = vpop.permute.xlu1 %94 }
  0x82   :  { %v75_v40 = vpop.permute.xlu0 %74  ;;  %v300_v50 = vmul.f32 %v801_v41, %v95_v39  ;;  %v120_v63 = vmul.f32 %v526_v54, %v95_v39 }
  0x83   :  { %v296_v44 = vmul.f32 %v801_v41, %v75_v40  ;;  %v118_v58 = vmul.f32 %v526_v54, %v75_v40 }
  0x85   :  { %v100_v42 = vpop.permute.xlu1 %99 }
  0x86   :  { %v80_v43 = vpop.permute.xlu0 %79  ;;  %v301_v51 = vmul.f32 %v801_v41, %v100_v42  ;;  %v121_v61 = vmul.f32 %v526_v54, %v100_v42 }
  0x87   :  { %v297_v45 = vmul.f32 %v801_v41, %v80_v43  ;;  %v119_v57 = vmul.f32 %v526_v54, %v80_v43 }
  0x89   :  { %v132_v46 = vpop.permute.xlu1 %131 }
  0x8a   :  { %v127_v47 = vpop.permute.xlu0 %126  ;;  %v805_v48 = vadd.f32 %v297_v45, %v132_v46  ;;  %v165_v62 = vadd.f32 %v132_v46, %v119_v57  ;;  %v41_v57 = vld [vmem:[%s937_s2 + $0x10] sm:$0xff] }
  0x8b   :  { %v807_v49 = vadd.f32 %v296_v44, %v127_v47  ;;  %v164_v0 = vadd.f32 %v127_v47, %v118_v58  ;;  %v45_v58 = vld [vmem:[%s937_s2 + $0x30] sm:$0xff] }
  0x8c   :  { %575 = vtanh.f32 %v165_v62 }
  0x8d   :  { %v152_v52 = vpop.permute.xlu1 %151  ;;  %577 = vtanh.f32 %v164_v0 }
  0x8e   :  { %v147_v53 = vpop.permute.xlu0 %146  ;;  %v814_v55 = vadd.f32 %v301_v51, %v152_v52  ;;  %v167_v1 = vadd.f32 %v152_v52, %v121_v61 }
  0x8f   :  { %v816_v56 = vadd.f32 %v300_v50, %v147_v53  ;;  %v166_v4 = vadd.f32 %v147_v53, %v120_v63  ;;  %v40_v53 = vld [vmem:[%s937_s2 + $0x8] sm:$0xff] }
  0x90   :  { %579 = vtanh.f32 %v167_v1 }
  0x91   :  { %v110_v59 = vpop.permute.xlu1 %109  ;;  %581 = vtanh.f32 %v166_v4 }
  0x92   :  { %v105_v60 = vpop.permute.xlu0 %104  ;;  %v303_v2 = vmul.f32 %v801_v41, %v110_v59  ;;  %v123_v13 = vmul.f32 %v526_v54, %v110_v59  ;;  %v42_v59 = vld [vmem:[%s937_s2 + $0x18] sm:$0xff] }
  0x93   :  { %v302_v3 = vmul.f32 %v801_v41, %v105_v60  ;;  %v122_v16 = vmul.f32 %v526_v54, %v105_v60  ;;  %v44_v54 = vld [vmem:[%s937_s2 + $0x28] sm:$0xff]  ;;  %v46_v60 = vld [vmem:[%s937_s2 + $0x38] sm:$0xff] }
  0x95   :  { %v162_v5 = vpop.permute.xlu1 %161 }
  0x96   :  { %v157_v6 = vpop.permute.xlu0 %156  ;;  %v820_v7 = vadd.f32 %v303_v2, %v162_v5  ;;  %v576_v14 = vpop.eup %575  ;;  %v169_v17 = vadd.f32 %v162_v5, %v123_v13 }
  0x97   :  { %v822_v8 = vadd.f32 %v302_v3, %v157_v6  ;;  %v578_v15 = vpop.eup %577  ;;  %v168_v22 = vadd.f32 %v157_v6, %v122_v16 }
  0x98   :  { %583 = vtanh.f32 %v169_v17 }
  0x99   :  { %v824_v9 = vpop.permute.xlu1 %183  ;;  %585 = vtanh.f32 %v168_v22 }
  0x9a   :  { %v826_v10 = vpop.permute.xlu0 %178  ;;  %v580_v20 = vpop.eup %579  ;;  %v217_v23 = vmul.f32 %v576_v14, %v824_v9 }
  0x9b   :  { %v582_v21 = vpop.eup %581  ;;  %v216_v24 = vmul.f32 %v578_v15, %v826_v10 }
  0x9d   :  { %v828_v11 = vpop.permute.xlu1 %203 }
  0x9e   :  { %v830_v12 = vpop.permute.xlu0 %198  ;;  %v219_v25 = vmul.f32 %v580_v20, %v828_v11 }
  0x9f   :  { %v218_v26 = vmul.f32 %v582_v21, %v830_v12 }
  0xa1   :  { %v832_v18 = vpop.permute.xlu1 %229 }
  0xa2   :  { %v834_v19 = vpop.permute.xlu0 %224  ;;  %v263_v29 = vadd.f32 %v832_v18, %v217_v23  ;;  %v584_v37 = vpop.eup %583 }
  0xa3   :  { %v262_v30 = vadd.f32 %v834_v19, %v216_v24  ;;  %v586_v39 = vpop.eup %585 }
  0xa5   :  { %v840_v27 = vpop.permute.xlu1 %249 }
  0xa6   :  { %v842_v28 = vpop.permute.xlu0 %244  ;;  %v265_v31 = vadd.f32 %v840_v27, %v219_v25 }
  0xa7   :  { %v264_v32 = vadd.f32 %v842_v28, %v218_v26 }
  0xa8   :  { %v848_v33 = vmul.f32 %v265_v31, %v263_v29 }
  0xa9   :  { %v850_v34 = vmul.f32 %v264_v32, %v262_v30  ;;  %v853_v35 = vpop.permute.xlu1 %213 }
  0xaa   :  { %587 = vtanh.f32 %v848_v33  ;;  %v856_v36 = vpop.permute.xlu0 %208  ;;  %v221_v40 = vmul.f32 %v584_v37, %v853_v35 }
  0xab   :  { %589 = vtanh.f32 %v850_v34  ;;  %v220_v43 = vmul.f32 %v586_v39, %v856_v36 }
  0xad   :  { %v858_v38 = vpop.permute.xlu1 %259 }
  0xae   :  { %v861_v42 = vpop.permute.xlu0 %254  ;;  %v267_v44 = vadd.f32 %v858_v38, %v221_v40 }
  0xaf   :  { %v266_v46 = vadd.f32 %v861_v42, %v220_v43 }
  0xb1   :  { %v90_v61 = vpop.permute.xlu1 %89 }
  0xb2   :  { %v85_v62 = vpop.permute.xlu0 %84  ;;  %v299_v3 = vmul.f32 %v801_v41, %v90_v61 }
  0xb3   :  { %v298_v14 = vmul.f32 %v801_v41, %v85_v62 }
  0xb4   :  { %v588_v45 = vpop.eup %587 }
  0xb5   :  { %v590_v47 = vpop.eup %589  ;;  %v866_v50 = vmul.f32 %v588_v45, %v267_v44  ;;  %v142_v63 = vpop.permute.xlu1 %141 }
  0xb6   :  { %v868_v51 = vmul.f32 %v590_v47, %v266_v46  ;;  %v137_v0 = vpop.permute.xlu0 %136  ;;  %v307_v17 = vadd.f32 %v299_v3, %v142_v63 }
  0xb7   :  { %v306_v20 = vadd.f32 %v298_v14, %v137_v0 }
  0xb8   :  { %v565_v52 = vpack.c.bf16 %v866_v50, %v868_v51 }
  0xba   :  { %566 = vmatprep.subr.bf16.mxu0 %v565_v52  ;;  %569 = vmatprep.subr.bf16.mxu1 %v565_v52  ;;  %v189_v31 = vpop.permute.xlu0 %188 }
  0xbb   :  { %568 = vmatpush3.bf16.msra.mxu0 %v565_v52  ;;  %570 = vmatpush3.bf16.msra.mxu1 %v565_v52 }
  0xbe   :  { %554 = vmatmul.mubr.msk.f32.vlgmr.msra.gmra.mrb[0].mxu0 %vm312_vm0, %v40_v53  ;;  %560 = vmatmul.mubr.msk.f32.vlgmr.msra.gmra.mrb[0].mxu1 %vm312_vm0, %v44_v54 }
  0xbf   :  { %556 = vmatprep.mubr.msk.f32.mxu0 %vm312_vm0, %v41_v57  ;;  %562 = vmatprep.mubr.msk.f32.mxu1 %vm312_vm0, %v45_v58 }
  0xc2   :  { %557 = vmatmul.mubr.msk.f32.gmra.mrb[2].mxu0 %vm312_vm0, %v42_v59  ;;  %563 = vmatmul.mubr.msk.f32.gmra.mrb[2].mxu1 %vm312_vm0, %v46_v60 }
 0x191   :  { %v555_v1 = vpop.f32.mrb[0].mxu0  ;;  %v561_v2 = vpop.f32.mrb[0].mxu1 }
 0x192   :  { %v443_v4 = vadd.f32 %v555_v1, %v805_v48  ;;  %v447_v5 = vadd.f32 %v561_v2, %v814_v55  ;;  %v403_v6 = vpop.f32.mrb[1].mxu0  ;;  %v423_v13 = vpop.f32.mrb[1].mxu1 }
 0x193   :  { %v442_v15 = vadd.f32 %v403_v6, %v807_v49  ;;  %v446_v16 = vadd.f32 %v423_v13, %v816_v56  ;;  %v194_v56 = vpop.permute.xlu1 %193 }
 0x194   :  { %591 = vtanh.f32 %v443_v4 }
 0x195   :  { %593 = vtanh.f32 %v447_v5  ;;  %v558_v21 = vpop.f32.mrb[2].mxu0  ;;  %v564_v22 = vpop.f32.mrb[2].mxu1 }
 0x196   :  { %595 = vtanh.f32 %v442_v15  ;;  %v445_v23 = vadd.f32 %v558_v21, %v307_v17  ;;  %v449_v48 = vadd.f32 %v564_v22, %v820_v7  ;;  %v413_v24 = vpop.f32.mrb[3].mxu0  ;;  %v433_v55 = vpop.f32.mrb[3].mxu1 }
 0x197   :  { %597 = vtanh.f32 %v446_v16  ;;  %v444_v25 = vadd.f32 %v413_v24, %v306_v20  ;;  %v448_v41 = vadd.f32 %v433_v55, %v822_v8 }
 0x198   :  { %599 = vtanh.f32 %v445_v23 }
 0x199   :  { %601 = vtanh.f32 %v444_v25 }
 0x19a   :  { %603 = vtanh.f32 %v449_v48 }
 0x19b   :  { %605 = vtanh.f32 %v448_v41 }
 0x19e   :  { %v592_v49 = vpop.eup %591 }
 0x19f   :  { %v594_v26 = vpop.eup %593  ;;  %v459_v29 = vmul.f32 %v592_v49, %v824_v9  ;;  %v240_v9 = vpop.permute.xlu1 %239 }
 0x1a0   :  { %v596_v30 = vpop.eup %595  ;;  %v463_v32 = vmul.f32 %v594_v26, %v828_v11 }
 0x1a1   :  { %v598_v37 = vpop.eup %597  ;;  %v467_v7 = vadd.f32 %v459_v29, %v832_v18  ;;  %v458_v39 = vmul.f32 %v596_v30, %v826_v10  ;;  %v235_v18 = vpop.permute.xlu0 %234 }
 0x1a2   :  { %v600_v40 = vpop.eup %599  ;;  %v471_v43 = vadd.f32 %v463_v32, %v840_v27  ;;  %v462_v8 = vmul.f32 %v598_v37, %v830_v12 }
 0x1a3   :  { %v466_v44 = vadd.f32 %v458_v39, %v834_v19  ;;  %v461_v45 = vmul.f32 %v600_v40, %v194_v56  ;;  %v602_v46 = vpop.eup %601  ;;  %v284_v61 = vpop.permute.xlu1 %283 }
 0x1a4   :  { %v477_v47 = vmul.f32 %v471_v43, %v467_v7  ;;  %v470_v52 = vadd.f32 %v462_v8, %v842_v28  ;;  %v460_v53 = vmul.f32 %v602_v46, %v189_v31  ;;  %v604_v58 = vpop.eup %603 }
 0x1a5   :  { %v469_v11 = vadd.f32 %v461_v45, %v240_v9  ;;  %v606_v59 = vpop.eup %605  ;;  %v465_v60 = vmul.f32 %v604_v58, %v853_v35  ;;  %v279_v62 = vpop.permute.xlu0 %278 }
 0x1a6   :  { %v476_v54 = vmul.f32 %v470_v52, %v466_v44  ;;  %v468_v57 = vadd.f32 %v460_v53, %v235_v18  ;;  %v464_v28 = vmul.f32 %v606_v59, %v856_v36  ;;  %v286_v13 = vmul.f32 %v279_v62, %v868_v51 }
 0x1a7   :  { %v475_v10 = vmul.f32 %v469_v11, %v848_v33  ;;  %v473_v63 = vadd.f32 %v465_v60, %v858_v38  ;;  %v495_v3 = vpop.permute.xlu1 %494 }
 0x1a8   :  { %v474_v12 = vmul.f32 %v468_v57, %v850_v34  ;;  %v472_v33 = vadd.f32 %v464_v28, %v861_v42  ;;  %v287_v34 = vmul.f32 %v284_v61, %v866_v50  ;;  %v509_v42 = vstv %s942_s7 }
 0x1a9   :  { %v479_v27 = vadd.f32 %v477_v47, %v475_v10  ;;  %v490_v6 = vpop.permute.xlu0 %489 }
 0x1aa   :  { %v478_v19 = vadd.f32 %v476_v54, %v474_v12 }
 0x1ab   :  { %607 = vtanh.f32 %v479_v27 }
 0x1ac   :  { %609 = vtanh.f32 %v478_v19 }
 0x1b5   :  { %v608_v0 = vpop.eup %607 }
 0x1b6   :  { %v483_v1 = vmul.f32 %v608_v0, %v473_v63  ;;  %v610_v2 = vpop.eup %609 }
 0x1b7   :  { %v482_v4 = vmul.f32 %v610_v2, %v472_v33 }
 0x1b8   :  { %v498_v5 = vmul.f32 %v495_v3, %v483_v1 }
 0x1b9   :  { %v497_v35 = vmul.f32 %v490_v6, %v482_v4 }
 0x1ba   :  { %v500_v14 = vadd.f32 %v498_v5, %v287_v34 }
 0x1bb   :  { %v499_v15 = vadd.f32 %v497_v35, %v286_v13 }
 0x1bd   :  { %v501_v36 = vadd.f32 %v500_v14, %v499_v15 }
 0x1bf   :  { %v502_v16 = vrot.slane %v501_v36, 4 }
 0x1c1   :  { %v503_v17 = vadd.f32 %v502_v16, %v501_v36 }
 0x1c3   :  { %v504_v38 = vrot.slane %v503_v17, 2 }
 0x1c5   :  { %v505_v20 = vadd.f32 %v504_v38, %v503_v17 }
 0x1c7   :  { %v506_v21 = vrot.slane %v505_v20, 1 }
 0x1c9   :  { %v507_v50 = vadd.f32 %v506_v21, %v505_v20 }
 0x1cb   :  { %v510_v22 = vadd.f32 %v509_v42, %v507_v50 }
 0x1cd   :  { %511 = vst [vmem:[#allocation3] sm:$0x1] %v510_v22 }
 0x1ce   :  { %622 = shalt.err (!%p619_p4)
}
 0x1cf   :  { %s623_s28 = scalar_lea.hbm %s943_s8, 16 }
 0x1d0   :  { %p624_p5 = scmp.ne.s32.totalorder %s943_s8, %s623_s28  ;;  %p627_p6 = scmp.lt.u32.totalorder %s623_s28, %s943_s8 }
 0x1d2   :  { %p629_p7 = pnand %p627_p6, %p624_p5 }
 0x1d4   :  { %632 = shalt.err (!%p629_p7)
}
 0x1d5   :  { %521 = dma.vmem_to_hbm [thread:$0]  %s519_s25, 16, %s943_s8, [#allocation4]  }
 0x1d6   :  { %633 = dma.done.wait [#allocation4], 16  }
 0x1d7   :  { %634 = vsyncadd [#allocation4], 4294967280 }
 0x1d8   :  { %525 = vsyncpa [#allocation4], 1 }

</bundles_post_ra>
